<compile_context>
chip_gen: v7x
topology: tpu7x:2x2x1
jax: 0.10.0
libtpu: 0.0.40
codegen_flags: <defaults>
</compile_context>

<pallas_src>
import numpy as np
import jax
import jax.numpy as jnp
from jax.experimental import pallas as pl
from jax.experimental.pallas import tpu as pltpu

NEG = -10000.0   # pad value used by the PyTorch module
BIG = 1.0e9      # boundary bias: an invalid (wrapped) tap never wins the max


def _round_up(v, m):
    return ((v + m - 1) // m) * m


def _make_kernel(n, width, W, HWp):
    """Kernel over (bt, HWp) blocks of flattened (H*W) planes.

    pen_ref holds the resident (2n, HWp) penalty table:
      row k     : coef*se[k] + horizontal boundary bias for shift s = k-width
      row n + k : coef*se[k] + vertical   boundary bias for shift s = k-width
    """

    def kernel(pen_ref, x_ref, o_ref):
        x = x_ref[...]

        # ---- horizontal pass: acc[h,w] = max_s x[h, w+s] - coef*se[s+width] ----
        acc = x                                             # center tap (se == 0)
        for k in range(n):
            s = k - width
            if s == 0:
                continue
            shifted = pltpu.roll(x, (-s) % HWp, 1)          # shifted[l] = x[l + s]
            acc = jnp.maximum(acc, shifted - pen_ref[k:k + 1, :])

        # ---- vertical pass: out[h,w] = max_s acc[h+s, w] - coef*se[s+width] ----
        out = acc                                           # center tap
        for k in range(n):
            s = k - width
            if s == 0:
                continue
            shifted = pltpu.roll(acc, (-s * W) % HWp, 1)    # shifted[l] = acc[l + s*W]
            out = jnp.maximum(out, shifted - pen_ref[n + k:n + k + 1, :])

        o_ref[...] = out

    return kernel


def dilation2d_single(im, se_coef, *, scale, width):
    """im: (N, C, H, W) float32; se_coef: scalar. Returns (N, C, H, W)."""
    N, C, H, W = im.shape
    n = 2 * width + 1
    # Deterministic "parameter" from __init__: se[k] = (k-width)^2 / (4*scale)
    se_vals = np.array([(x * x) / (4.0 * scale) for x in range(-width, width + 1)],
                       dtype=np.float32)

    B = N * C
    HW = H * W
    HWp = _round_up(HW, 128)        # lane-dense output/rolls for any H, W

    x = im.reshape(B, HW).astype(jnp.float32)
    if HWp != HW:
        x = jnp.pad(x, ((0, 0), (0, HWp - HW)), constant_values=NEG)

    # Host-built boundary bias per tap (grid-invariant, so built once here).
    l = np.arange(HWp)
    col = l % W
    in_plane = l < HW
    bias = np.zeros((2 * n, HWp), dtype=np.float32)
    for k in range(n):
        s = k - width
        if s == 0:
            continue
        valid_h = (col < (W - s)) if s > 0 else (col >= -s)
        valid_v = (l < (HW - s * W)) if s > 0 else (l >= -s * W)
        bias[k] = np.where(valid_h & in_plane, 0.0, BIG)
        bias[n + k] = np.where(valid_v & in_plane, 0.0, BIG)

    # Fold the runtime scalar se_coef into the tiny table in the wrapper, so the
    # kernel needs no scalar prefetch and no per-tap mask/select work.
    # NOTE: invalid taps contribute ~-1e9 instead of exactly NEG - coef*se[k];
    # identical output as long as im > -10000 (the center tap always wins over
    # the pad value), which matches the reference for any realistic input.
    offs = jnp.asarray(se_coef, jnp.float32) * jnp.asarray(se_vals)       # (n,)
    pen = jnp.asarray(bias) + jnp.concatenate([offs, offs])[:, None]      # (2n, HWp)

    # --- tiling: ~4 MiB lane-dense (bt, HWp) blocks ---------------------------
    plane_bytes = HWp * 4
    target_bytes = 4 << 20
    rows = max(1, target_bytes // plane_bytes)
    if B <= 8 and B <= rows:
        bt = B                                   # single full-extent block
    else:
        bt = min(rows, B)
        if B > 8:
            # v7x has 2 TensorCores: give the "parallel" batch axis >= 2 steps.
            bt = min(bt, _round_up(pl.cdiv(B, 2), 8))
        bt = max(8, (bt // 8) * 8)               # sublane dim multiple of 8
        bt = min(bt, B)
    # TODO(synk): for very large H*W planes (8*plane_bytes >> 4 MiB) this
    # whole-plane-per-row layout needs a second grid axis over HW with halo
    # handling to stay inside v7x's 64 MiB VMEM; not implemented here.
    grid_b = pl.cdiv(B, bt)

    out = pl.pallas_call(
        _make_kernel(n, width, W, HWp),
        out_shape=jax.ShapeDtypeStruct((B, HWp), jnp.float32),
        grid_spec=pltpu.PrefetchScalarGridSpec(
            num_scalar_prefetch=0,
            grid=(grid_b,),
            in_specs=[
                pl.BlockSpec((2 * n, HWp), lambda b: (0, 0)),  # resident table
                pl.BlockSpec((bt, HWp), lambda b: (b, 0)),
            ],
            out_specs=pl.BlockSpec((bt, HWp), lambda b: (b, 0)),
        ),
        compiler_params=pltpu.CompilerParams(
            dimension_semantics=("parallel",),
            vmem_limit_bytes=48 * 1024 * 1024),
    )(pen, x)

    if HWp != HW:
        out = out[:, :HW]
    # TODO(synk): a bf16 compute/storage path would halve VALU cycles and HBM
    # traffic on v6e/v7x if the 1e-5 tolerance can be relaxed (not on v5e).
    return out.reshape(N, C, H, W)


def _reference(im, se_coef, *, scale, width):
    """Pure-JAX reproduction of the PyTorch forward, for verification."""
    N, C, H, W = im.shape
    n = 2 * width + 1
    se = jnp.array([(x * x) / (4.0 * scale) for x in range(-width, width + 1)],
                   jnp.float32)
    xp = jnp.pad(im, ((0, 0), (0, 0), (0, 0), (width, width)),
                 constant_values=NEG)
    tmp = jnp.max(jnp.stack(
        [xp[:, :, :, k:k + W] - se_coef * se[k] for k in range(n)], 0), 0)
    yp = jnp.pad(tmp, ((0, 0), (0, 0), (width, width), (0, 0)),
                 constant_values=NEG)
    out = jnp.max(jnp.stack(
        [yp[:, :, k:k + H, :] - se_coef * se[k] for k in range(n)], 0), 0)
    return out


if __name__ == "__main__":
    key = jax.random.PRNGKey(0)
    N, C, H, W = 2, 4, 16, 16
    scale, width = 1.0, 3          # structuring element length n = 7
    se_coef = 0.5

    im = jax.random.normal(key, (N, C, H, W), dtype=jnp.float32)

    out = dilation2d_single(im, se_coef, scale=scale, width=width)
    out = jax.block_until_ready(out)

    ref = _reference(im, se_coef, scale=scale, width=width)
    assert out.shape == (N, C, H, W)
    assert jnp.allclose(out, ref, atol=1e-5, rtol=1e-5), "mismatch vs reference"

    print("KERNEL_OK")
</pallas_src>

<mosaic_0001>
module attributes {stable_mosaic.version = 11 : i64} {
  func.func @kernel(%arg0: i32, %arg1: memref<14x256xf32, #tpu.memory_space<vmem>>, %arg2: memref<8x256xf32, #tpu.memory_space<vmem>>, %arg3: memref<8x256xf32, #tpu.memory_space<vmem>>) attributes {dimension_semantics = [#tpu.dimension_semantics<parallel>], iteration_bounds = array<i64: 1>, scalar_prefetch = 0 : i64, scratch_operands = 0 : i64, tpu.core_type = #tpu.core_type<tc>, window_params = [{pipeline_mode = #tpu.pipeline_mode<synchronous>, transform_indices = @transform_0, window_bounds = array<i64: 14, 256>}, {transform_indices = @transform_1, window_bounds = array<i64: 8, 256>}, {transform_indices = @transform_2, window_bounds = array<i64: 8, 256>}]} {
    %c0 = arith.constant 0 : index
    %c0_0 = arith.constant 0 : index
    %0 = vector.load %arg2[%c0, %c0_0] : memref<8x256xf32, #tpu.memory_space<vmem>>, vector<8x256xf32>
    %c3_i32 = arith.constant 3 : i32
    %1 = tpu.dynamic_rotate %0 by %c3_i32 dim 1 : vector<8x256xf32>, i32 -> vector<8x256xf32>
    %c0_1 = arith.constant 0 : index
    %c0_2 = arith.constant 0 : index
    %2 = vector.load %arg1[%c0_1, %c0_2] : memref<14x256xf32, #tpu.memory_space<vmem>>, vector<1x256xf32>
    %3 = vector.broadcast %2 : vector<1x256xf32> to vector<8x256xf32>
    %4 = arith.subf %1, %3 : vector<8x256xf32>
    %5 = arith.maximumf %0, %4 : vector<8x256xf32>
    %c2_i32 = arith.constant 2 : i32
    %6 = tpu.dynamic_rotate %0 by %c2_i32 dim 1 : vector<8x256xf32>, i32 -> vector<8x256xf32>
    %c1 = arith.constant 1 : index
    %c0_3 = arith.constant 0 : index
    %7 = vector.load %arg1[%c1, %c0_3] : memref<14x256xf32, #tpu.memory_space<vmem>>, vector<1x256xf32>
    %8 = vector.broadcast %7 : vector<1x256xf32> to vector<8x256xf32>
    %9 = arith.subf %6, %8 : vector<8x256xf32>
    %10 = arith.maximumf %5, %9 : vector<8x256xf32>
    %c1_i32 = arith.constant 1 : i32
    %11 = tpu.dynamic_rotate %0 by %c1_i32 dim 1 : vector<8x256xf32>, i32 -> vector<8x256xf32>
    %c2 = arith.constant 2 : index
    %c0_4 = arith.constant 0 : index
    %12 = vector.load %arg1[%c2, %c0_4] : memref<14x256xf32, #tpu.memory_space<vmem>>, vector<1x256xf32>
    %13 = vector.broadcast %12 : vector<1x256xf32> to vector<8x256xf32>
    %14 = arith.subf %11, %13 : vector<8x256xf32>
    %15 = arith.maximumf %10, %14 : vector<8x256xf32>
    %c255_i32 = arith.constant 255 : i32
    %16 = tpu.dynamic_rotate %0 by %c255_i32 dim 1 : vector<8x256xf32>, i32 -> vector<8x256xf32>
    %c4 = arith.constant 4 : index
    %c0_5 = arith.constant 0 : index
    %17 = vector.load %arg1[%c4, %c0_5] : memref<14x256xf32, #tpu.memory_space<vmem>>, vector<1x256xf32>
    %18 = vector.broadcast %17 : vector<1x256xf32> to vector<8x256xf32>
    %19 = arith.subf %16, %18 : vector<8x256xf32>
    %20 = arith.maximumf %15, %19 : vector<8x256xf32>
    %c254_i32 = arith.constant 254 : i32
    %21 = tpu.dynamic_rotate %0 by %c254_i32 dim 1 : vector<8x256xf32>, i32 -> vector<8x256xf32>
    %c5 = arith.constant 5 : index
    %c0_6 = arith.constant 0 : index
    %22 = vector.load %arg1[%c5, %c0_6] : memref<14x256xf32, #tpu.memory_space<vmem>>, vector<1x256xf32>
    %23 = vector.broadcast %22 : vector<1x256xf32> to vector<8x256xf32>
    %24 = arith.subf %21, %23 : vector<8x256xf32>
    %25 = arith.maximumf %20, %24 : vector<8x256xf32>
    %c253_i32 = arith.constant 253 : i32
    %26 = tpu.dynamic_rotate %0 by %c253_i32 dim 1 : vector<8x256xf32>, i32 -> vector<8x256xf32>
    %c6 = arith.constant 6 : index
    %c0_7 = arith.constant 0 : index
    %27 = vector.load %arg1[%c6, %c0_7] : memref<14x256xf32, #tpu.memory_space<vmem>>, vector<1x256xf32>
    %28 = vector.broadcast %27 : vector<1x256xf32> to vector<8x256xf32>
    %29 = arith.subf %26, %28 : vector<8x256xf32>
    %30 = arith.maximumf %25, %29 : vector<8x256xf32>
    %c48_i32 = arith.constant 48 : i32
    %31 = tpu.dynamic_rotate %30 by %c48_i32 dim 1 : vector<8x256xf32>, i32 -> vector<8x256xf32>
    %c7 = arith.constant 7 : index
    %c0_8 = arith.constant 0 : index
    %32 = vector.load %arg1[%c7, %c0_8] : memref<14x256xf32, #tpu.memory_space<vmem>>, vector<1x256xf32>
    %33 = vector.broadcast %32 : vector<1x256xf32> to vector<8x256xf32>
    %34 = arith.subf %31, %33 : vector<8x256xf32>
    %35 = arith.maximumf %30, %34 : vector<8x256xf32>
    %c32_i32 = arith.constant 32 : i32
    %36 = tpu.dynamic_rotate %30 by %c32_i32 dim 1 : vector<8x256xf32>, i32 -> vector<8x256xf32>
    %c8 = arith.constant 8 : index
    %c0_9 = arith.constant 0 : index
    %37 = vector.load %arg1[%c8, %c0_9] : memref<14x256xf32, #tpu.memory_space<vmem>>, vector<1x256xf32>
    %38 = vector.broadcast %37 : vector<1x256xf32> to vector<8x256xf32>
    %39 = arith.subf %36, %38 : vector<8x256xf32>
    %40 = arith.maximumf %35, %39 : vector<8x256xf32>
    %c16_i32 = arith.constant 16 : i32
    %41 = tpu.dynamic_rotate %30 by %c16_i32 dim 1 : vector<8x256xf32>, i32 -> vector<8x256xf32>
    %c9 = arith.constant 9 : index
    %c0_10 = arith.constant 0 : index
    %42 = vector.load %arg1[%c9, %c0_10] : memref<14x256xf32, #tpu.memory_space<vmem>>, vector<1x256xf32>
    %43 = vector.broadcast %42 : vector<1x256xf32> to vector<8x256xf32>
    %44 = arith.subf %41, %43 : vector<8x256xf32>
    %45 = arith.maximumf %40, %44 : vector<8x256xf32>
    %c240_i32 = arith.constant 240 : i32
    %46 = tpu.dynamic_rotate %30 by %c240_i32 dim 1 : vector<8x256xf32>, i32 -> vector<8x256xf32>
    %c11 = arith.constant 11 : index
    %c0_11 = arith.constant 0 : index
    %47 = vector.load %arg1[%c11, %c0_11] : memref<14x256xf32, #tpu.memory_space<vmem>>, vector<1x256xf32>
    %48 = vector.broadcast %47 : vector<1x256xf32> to vector<8x256xf32>
    %49 = arith.subf %46, %48 : vector<8x256xf32>
    %50 = arith.maximumf %45, %49 : vector<8x256xf32>
    %c224_i32 = arith.constant 224 : i32
    %51 = tpu.dynamic_rotate %30 by %c224_i32 dim 1 : vector<8x256xf32>, i32 -> vector<8x256xf32>
    %c12 = arith.constant 12 : index
    %c0_12 = arith.constant 0 : index
    %52 = vector.load %arg1[%c12, %c0_12] : memref<14x256xf32, #tpu.memory_space<vmem>>, vector<1x256xf32>
    %53 = vector.broadcast %52 : vector<1x256xf32> to vector<8x256xf32>
    %54 = arith.subf %51, %53 : vector<8x256xf32>
    %55 = arith.maximumf %50, %54 : vector<8x256xf32>
    %c208_i32 = arith.constant 208 : i32
    %56 = tpu.dynamic_rotate %30 by %c208_i32 dim 1 : vector<8x256xf32>, i32 -> vector<8x256xf32>
    %c13 = arith.constant 13 : index
    %c0_13 = arith.constant 0 : index
    %57 = vector.load %arg1[%c13, %c0_13] : memref<14x256xf32, #tpu.memory_space<vmem>>, vector<1x256xf32>
    %58 = vector.broadcast %57 : vector<1x256xf32> to vector<8x256xf32>
    %59 = arith.subf %56, %58 : vector<8x256xf32>
    %60 = arith.maximumf %55, %59 : vector<8x256xf32>
    %c0_14 = arith.constant 0 : index
    %c0_15 = arith.constant 0 : index
    %61 = vector.load %arg3[%c0_14, %c0_15] : memref<8x256xf32, #tpu.memory_space<vmem>>, vector<8x256xf32>
    tpu.vector_store %arg3[%c0_14, %c0_15], %60 {strides = array<i32>} : memref<8x256xf32, #tpu.memory_space<vmem>>, vector<8x256xf32>,
    return
  }
  func.func @transform_0(%arg0: i32) -> (i32, i32) {
    %c0_i32 = arith.constant 0 : i32
    %c0_i32_0 = arith.constant 0 : i32
    %c0_i32_1 = arith.constant 0 : i32
    return %c0_i32, %c0_i32_0 : i32, i32
  }
  func.func @transform_1(%arg0: i32) -> (i32, i32) {
    %c0_i32 = arith.constant 0 : i32
    %c0_i32_0 = arith.constant 0 : i32
    return %arg0, %c0_i32 : i32, i32
  }
  func.func @transform_2(%arg0: i32) -> (i32, i32) {
    %c0_i32 = arith.constant 0 : i32
    %c0_i32_0 = arith.constant 0 : i32
    return %arg0, %c0_i32 : i32, i32
  }
}

</mosaic_0001>

<bundles_post_ra>
// kernel: tpu_custom_call.1
= control target key start
LH: loop header
LB: loop body
LE: loop exit
PB: predicated region body
PF: predicated region fallthrough
CT: control target
= control target key end

     0   :  { %7 = vsyncpa [#allocation3], 0  ;;  %s599_s0 = inlined_call_operand.hbm [shape: f32[14,256], index: 0, kind: input, shape index: {}]   ;;  %s600_s1 = inlined_call_operand.hbm [shape: f32[8,256], index: 1, kind: input, shape index: {}]   ;;  %s601_s2 = inlined_call_operand.hbm [shape: f32[8,256], index: 2, kind: output, shape index: {}]  }
   0x1   :  { %8 = vsyncpa [#allocation6], 0 }
   0x2   :  { %9 = vsyncpa [#allocation4], 0  ;;  %s435_s9 = smov [#allocation2]   ;;  %s363_s13 = scalar_lea.hbm %s599_s0, 512 }
   0x3   :  { %s15_s10 = sshll.u32 %s435_s9, 4  ;;  %p364_p0 = scmp.ne.s32.totalorder %s599_s0, %s363_s13  ;;  %s16_s10 = int_to_ptr.vmem [resolvable:$true] %s15_s10 }
   0x4   :  { %p367_p1 = scmp.lt.u32.totalorder %s363_s13, %s599_s0 }
   0x6   :  { %p369_p2 = pnand %p367_p1, %p364_p0 }
   0x8   :  { %372 = shalt.err (!%p369_p2)
}
   0x9   :  { %s373_s18 = scalar_lea.vmem %s16_s10, 512  ;;  %p378_p4 = scmp.lt.s32.totalorder %s16_s10, %s16_s10 }
   0xa   :  { %p374_p3 = scmp.ne.s32.totalorder %s16_s10, %s373_s18  ;;  %p379_p5 = scmp.lt.s32.totalorder %s373_s18, %s373_s18 }
   0xc   :  { %p380_p6 = por %p379_p5, %p378_p4 }
   0xe   :  { %p381_p7 = pnand %p380_p6, %p374_p3 }
  0x10   :  { %384 = shalt.err (!%p381_p7)
}
  0x11   :  { %s436_s19 = smov 256   ;;  %s437_s20 = smov 16  }
  0x12   :  { %21 = dma.hbm_to_vmem [thread:$0]  %s599_s0, 512, %s16_s10, [#allocation3], %s436_s19, %s436_s19, %s437_s20  }
  0x13   :  { %s438_s23 = smov [#allocation5]   ;;  %s385_s27 = scalar_lea.hbm %s600_s1, 256 }
  0x14   :  { %s28_s24 = sshll.u32 %s438_s23, 4  ;;  %p386_p8 = scmp.ne.s32.totalorder %s600_s1, %s385_s27  ;;  %s29_s24 = int_to_ptr.vmem [resolvable:$true] %s28_s24 }
  0x15   :  { %p389_p9 = scmp.lt.u32.totalorder %s385_s27, %s600_s1 }
  0x17   :  { %p391_p10 = pnand %p389_p9, %p386_p8 }
  0x19   :  { %394 = shalt.err (!%p391_p10)
}
  0x1a   :  { %s395_s4 = scalar_lea.vmem %s29_s24, 256  ;;  %p400_p12 = scmp.lt.s32.totalorder %s29_s24, %s29_s24 }
  0x1b   :  { %p396_p11 = scmp.ne.s32.totalorder %s29_s24, %s395_s4  ;;  %p401_p13 = scmp.lt.s32.totalorder %s395_s4, %s395_s4 }
  0x1d   :  { %p402_p0 = por %p401_p13, %p400_p12 }
  0x1f   :  { %p403_p1 = pnand %p402_p0, %p396_p11 }
  0x21   :  { %406 = shalt.err (!%p403_p1)
}
  0x22   :  { %31 = dma.hbm_to_vmem [thread:$0]  %s600_s1, 256, %s29_s24, [#allocation6]  }
  0x23   :  { %429 = dma.done.wait [#allocation3], 512  }
  0x24   :  { %430 = vsyncadd [#allocation3], 4294966784 }
  0x25   :  { %431 = dma.done.wait [#allocation6], 256  }
  0x26   :  { %432 = vsyncadd [#allocation6], 4294967040  ;;  %v491_v0 = vld [vmem:[#allocation5] sm:$0xff]  ;;  %s439_s6 = smov 2   ;;  %s440_s7 = smov 3   ;;  %v495_v1 = vld [vmem:[#allocation5 + $0x8] sm:$0xff]  ;;  %v44_v2 = vlaneseq }
  0x27   :  { %65 = vrot.lane.b32.xlu1 %v491_v0, %s439_s6  ;;  %40 = vrot.lane.b32.xlu0 %v491_v0, %s440_s7  ;;  %s441_s8 = smov 1   ;;  %s442_s1 = smov 127   ;;  %v49_v7 = vld [vmem:[#allocation2] ss:$8 sm:$0x3] }
  0x28   :  { %s443_s9 = smov 126   ;;  %s444_s10 = smov 125   ;;  %v52_v3 = vshrl.u32 %v44_v2, 7  ;;  %v507_v4 = vand.u32 127, %v44_v2 }
  0x29   :  { %v73_v14 = vld [vmem:[#allocation2 + $0x1] ss:$8 sm:$0x3]  ;;  %v97_v19 = vld [vmem:[#allocation2 + $0x2] ss:$8 sm:$0x3] }
  0x2a   :  { %v509_v5 = vsub.s32 0, %v52_v3  ;;  %v511_v6 = vsub.s32 1, %v52_v3  ;;  %vm46_vm0 = vcmp.lt.s32.totalorder %v507_v4, 3  ;;  %vm69_vm1 = vcmp.lt.s32.totalorder %v507_v4, 2  ;;  %s445_s11 = smov 48   ;;  %s446_s12 = smov 32  }
  0x2b   :  { %67 = vrot.lane.b32.xlu1 %v495_v1, %s439_s6  ;;  %42 = vrot.lane.b32.xlu0 %v495_v1, %s440_s7  ;;  %vm93_vm2 = vcmp.lt.s32.totalorder %v507_v4, 1  ;;  %v121_v24 = vld [vmem:[#allocation2 + $0x4] ss:$8 sm:$0x3]  ;;  %vm117_vm3 = vcmp.lt.s32.totalorder %v507_v4, 127  ;;  %vm141_vm4 = vcmp.lt.s32.totalorder %v507_v4, 126 }
  0x2c   :  { %v54_v10 = vrot.slane %v49_v7, %v509_v5  ;;  %v58_v11 = vrot.slane %v49_v7, %v511_v6  ;;  %v78_v20 = vrot.slane %v73_v14, %v509_v5  ;;  %v82_v21 = vrot.slane %v73_v14, %v511_v6  ;;  %v145_v31 = vld [vmem:[#allocation2 + $0x5] ss:$8 sm:$0x3]  ;;  %v169_v48 = vld [vmem:[#allocation2 + $0x6] ss:$8 sm:$0x3] }
  0x2d   :  { %v102_v29 = vrot.slane %v97_v19, %v509_v5  ;;  %v106_v30 = vrot.slane %v97_v19, %v511_v6  ;;  %v126_v34 = vrot.slane %v121_v24, %v509_v5  ;;  %v130_v38 = vrot.slane %v121_v24, %v511_v6  ;;  %s447_s13 = smov 112   ;;  %s448_s14 = smov 96   ;;  %v193_v14 = vld [vmem:[#allocation2 + $0x7] ss:$8 sm:$0x3] }
  0x2e   :  { %v150_v42 = vrot.slane %v145_v31, %v509_v5  ;;  %v154_v43 = vrot.slane %v145_v31, %v511_v6  ;;  %vm165_vm5 = vcmp.lt.s32.totalorder %v507_v4, 125  ;;  %v174_v55 = vrot.slane %v169_v48, %v509_v5  ;;  %s449_s15 = smov 80   ;;  %s450_s16 = smov [#allocation7]  }
  0x2f   :  { %91 = vrot.lane.b32.xlu1 %v495_v1, %s441_s8  ;;  %89 = vrot.lane.b32.xlu0 %v491_v0, %s441_s8  ;;  %v178_v56 = vrot.slane %v169_v48, %v511_v6  ;;  %vm189_vm6 = vcmp.lt.s32.totalorder %v507_v4, 48  ;;  %v202_v19 = vrot.slane %v193_v14, %v511_v6  ;;  %vm213_vm7 = vcmp.lt.s32.totalorder %v507_v4, 32  ;;  %s337_s17 = sshll.u32 %s450_s16, 4  ;;  %s338_s17 = int_to_ptr.vmem [resolvable:$true] %s337_s17 }
  0x30   :  { %vm237_vm8 = vcmp.lt.s32.totalorder %v507_v4, 16  ;;  %vm261_vm9 = vcmp.lt.s32.totalorder %v507_v4, 112  ;;  %vm285_vm10 = vcmp.lt.s32.totalorder %v507_v4, 96  ;;  %vm309_vm11 = vcmp.lt.s32.totalorder %v507_v4, 80  ;;  %s407_s18 = scalar_lea.vmem %s338_s17, 256  ;;  %p412_p3 = scmp.lt.s32.totalorder %s338_s17, %s338_s17 }
  0x31   :  { %p408_p2 = scmp.ne.s32.totalorder %s338_s17, %s407_s18  ;;  %p413_p4 = scmp.lt.s32.totalorder %s407_s18, %s407_s18 }
  0x33   :  { %115 = vrot.lane.b32.xlu1 %v495_v1, %s442_s1  ;;  %113 = vrot.lane.b32.xlu0 %v491_v0, %s442_s1  ;;  %p414_p5 = por %p413_p4, %p412_p3 }
  0x35   :  { %p415_p6 = pnand %p414_p5, %p408_p2 }
  0x37   :  { %139 = vrot.lane.b32.xlu1 %v495_v1, %s443_s9  ;;  %137 = vrot.lane.b32.xlu0 %v491_v0, %s443_s9 }
  0x3b   :  { %163 = vrot.lane.b32.xlu1 %v495_v1, %s444_s10  ;;  %161 = vrot.lane.b32.xlu0 %v491_v0, %s444_s10 }
  0x99   :  { %v66_v8 = vpop.permute.xlu1 %65  ;;  %v41_v9 = vpop.permute.xlu0 %40 }
  0x9d   :  { %v68_v12 = vpop.permute.xlu1 %67  ;;  %v43_v13 = vpop.permute.xlu0 %42 }
  0x9e   :  { %v47_v15 = vsel %vm46_vm0, %v41_v9, %v43_v13  ;;  %v48_v16 = vsel %vm46_vm0, %v43_v13, %v41_v9  ;;  %v70_v25 = vsel %vm69_vm1, %v66_v8, %v68_v12  ;;  %v71_v26 = vsel %vm69_vm1, %v68_v12, %v66_v8 }
  0x9f   :  { %v61_v17 = vsub.f32 %v48_v16, %v54_v10  ;;  %v62_v18 = vsub.f32 %v47_v15, %v58_v11  ;;  %v85_v35 = vsub.f32 %v71_v26, %v78_v20  ;;  %v86_v36 = vsub.f32 %v70_v25, %v82_v21  ;;  %v241_v20 = vld [vmem:[#allocation2 + $0x11] ss:$8 sm:$0x3] }
  0xa1   :  { %v92_v22 = vpop.permute.xlu1 %91  ;;  %v90_v23 = vpop.permute.xlu0 %89  ;;  %v63_v27 = vmax.f32 %v491_v0, %v61_v17  ;;  %v64_v28 = vmax.f32 %v495_v1, %v62_v18  ;;  %v217_v17 = vld [vmem:[#allocation2 + $0x10] ss:$8 sm:$0x3]  ;;  %v198_v18 = vrot.slane %v193_v14, %v509_v5 }
  0xa2   :  { %v94_v32 = vsel %vm93_vm2, %v90_v23, %v92_v22  ;;  %v95_v33 = vsel %vm93_vm2, %v92_v22, %v90_v23  ;;  %v222_v23 = vrot.slane %v217_v17, %v509_v5  ;;  %v226_v24 = vrot.slane %v217_v17, %v511_v6 }
  0xa3   :  { %v87_v44 = vmax.f32 %v63_v27, %v85_v35  ;;  %v88_v45 = vmax.f32 %v64_v28, %v86_v36  ;;  %v109_v46 = vsub.f32 %v95_v33, %v102_v29  ;;  %v110_v47 = vsub.f32 %v94_v32, %v106_v30  ;;  %v265_v27 = vld [vmem:[#allocation2 + $0x13] ss:$8 sm:$0x3] }
  0xa4   :  { %v246_v30 = vrot.slane %v241_v20, %v509_v5  ;;  %v250_v33 = vrot.slane %v241_v20, %v511_v6 }
  0xa5   :  { %v116_v37 = vpop.permute.xlu1 %115  ;;  %v114_v39 = vpop.permute.xlu0 %113  ;;  %v111_v57 = vmax.f32 %v87_v44, %v109_v46  ;;  %v112_v58 = vmax.f32 %v88_v45, %v110_v47 }
  0xa6   :  { %v118_v40 = vsel %vm117_vm3, %v114_v39, %v116_v37  ;;  %v119_v41 = vsel %vm117_vm3, %v116_v37, %v114_v39  ;;  %v270_v37 = vrot.slane %v265_v27, %v509_v5 }
  0xa7   :  { %v133_v49 = vsub.f32 %v118_v40, %v126_v34  ;;  %v134_v50 = vsub.f32 %v119_v41, %v130_v38  ;;  %v289_v34 = vld [vmem:[#allocation2 + $0x14] ss:$8 sm:$0x3]  ;;  %v274_v41 = vrot.slane %v265_v27, %v511_v6 }
  0xa8   :  { %v294_v45 = vrot.slane %v289_v34, %v509_v5  ;;  %v298_v46 = vrot.slane %v289_v34, %v511_v6 }
  0xa9   :  { %v140_v51 = vpop.permute.xlu1 %139  ;;  %v138_v52 = vpop.permute.xlu0 %137  ;;  %v135_v61 = vmax.f32 %v111_v57, %v133_v49  ;;  %v136_v62 = vmax.f32 %v112_v58, %v134_v50 }
  0xaa   :  { %v142_v53 = vsel %vm141_vm4, %v138_v52, %v140_v51  ;;  %v143_v54 = vsel %vm141_vm4, %v140_v51, %v138_v52  ;;  %v313_v51 = vld [vmem:[#allocation2 + $0x15] ss:$8 sm:$0x3] }
  0xab   :  { %v157_v59 = vsub.f32 %v142_v53, %v150_v42  ;;  %v158_v60 = vsub.f32 %v143_v54, %v154_v43 }
  0xad   :  { %v164_v63 = vpop.permute.xlu1 %163  ;;  %v162_v0 = vpop.permute.xlu0 %161  ;;  %v159_v3 = vmax.f32 %v135_v61, %v157_v59  ;;  %v160_v7 = vmax.f32 %v136_v62, %v158_v60  ;;  %v318_v60 = vrot.slane %v313_v51, %v509_v5  ;;  %v322_v61 = vrot.slane %v313_v51, %v511_v6 }
  0xae   :  { %v166_v1 = vsel %vm165_vm5, %v162_v0, %v164_v63  ;;  %v167_v2 = vsel %vm165_vm5, %v164_v63, %v162_v0 }
  0xaf   :  { %v181_v8 = vsub.f32 %v166_v1, %v174_v55  ;;  %v182_v9 = vsub.f32 %v167_v2, %v178_v56 }
  0xb1   :  { %v541_v10 = vmax.f32 %v159_v3, %v181_v8  ;;  %v543_v11 = vmax.f32 %v160_v7, %v182_v9 }
  0xb3   :  { %187 = vrot.lane.b32.xlu1 %v543_v11, %s445_s11  ;;  %185 = vrot.lane.b32.xlu0 %v541_v10, %s445_s11 }
  0xb7   :  { %211 = vrot.lane.b32.xlu1 %v543_v11, %s446_s12  ;;  %209 = vrot.lane.b32.xlu0 %v541_v10, %s446_s12 }
  0xbb   :  { %235 = vrot.lane.b32.xlu1 %v543_v11, %s437_s20  ;;  %233 = vrot.lane.b32.xlu0 %v541_v10, %s437_s20 }
  0xbf   :  { %259 = vrot.lane.b32.xlu1 %v543_v11, %s447_s13  ;;  %257 = vrot.lane.b32.xlu0 %v541_v10, %s447_s13 }
  0xc3   :  { %283 = vrot.lane.b32.xlu1 %v543_v11, %s448_s14  ;;  %281 = vrot.lane.b32.xlu0 %v541_v10, %s448_s14 }
  0xc7   :  { %307 = vrot.lane.b32.xlu1 %v543_v11, %s449_s15  ;;  %305 = vrot.lane.b32.xlu0 %v541_v10, %s449_s15 }
 0x125   :  { %v188_v12 = vpop.permute.xlu1 %187  ;;  %v186_v13 = vpop.permute.xlu0 %185 }
 0x126   :  { %v190_v21 = vsel %vm189_vm6, %v186_v13, %v188_v12  ;;  %v191_v22 = vsel %vm189_vm6, %v188_v12, %v186_v13 }
 0x127   :  { %v205_v31 = vsub.f32 %v191_v22, %v198_v18  ;;  %v206_v32 = vsub.f32 %v190_v21, %v202_v19 }
 0x129   :  { %v212_v15 = vpop.permute.xlu1 %211  ;;  %v210_v16 = vpop.permute.xlu0 %209  ;;  %v207_v47 = vmax.f32 %v541_v10, %v205_v31  ;;  %v208_v48 = vmax.f32 %v543_v11, %v206_v32 }
 0x12a   :  { %v214_v28 = vsel %vm213_vm7, %v210_v16, %v212_v15  ;;  %v215_v29 = vsel %vm213_vm7, %v212_v15, %v210_v16 }
 0x12b   :  { %v229_v38 = vsub.f32 %v215_v29, %v222_v23  ;;  %v230_v39 = vsub.f32 %v214_v28, %v226_v24 }
 0x12d   :  { %v236_v25 = vpop.permute.xlu1 %235  ;;  %v234_v26 = vpop.permute.xlu0 %233  ;;  %v231_v52 = vmax.f32 %v207_v47, %v229_v38  ;;  %v232_v53 = vmax.f32 %v208_v48, %v230_v39 }
 0x12e   :  { %v238_v35 = vsel %vm237_vm8, %v234_v26, %v236_v25  ;;  %v239_v36 = vsel %vm237_vm8, %v236_v25, %v234_v26 }
 0x12f   :  { %v253_v49 = vsub.f32 %v239_v36, %v246_v30  ;;  %v254_v50 = vsub.f32 %v238_v35, %v250_v33 }
 0x131   :  { %v260_v40 = vpop.permute.xlu1 %259  ;;  %v258_v42 = vpop.permute.xlu0 %257  ;;  %v255_v62 = vmax.f32 %v231_v52, %v253_v49  ;;  %v256_v63 = vmax.f32 %v232_v53, %v254_v50 }
 0x132   :  { %v262_v43 = vsel %vm261_vm9, %v258_v42, %v260_v40  ;;  %v263_v44 = vsel %vm261_vm9, %v260_v40, %v258_v42 }
 0x133   :  { %v277_v54 = vsub.f32 %v262_v43, %v270_v37  ;;  %v278_v55 = vsub.f32 %v263_v44, %v274_v41 }
 0x135   :  { %v284_v56 = vpop.permute.xlu1 %283  ;;  %v282_v57 = vpop.permute.xlu0 %281  ;;  %v279_v2 = vmax.f32 %v255_v62, %v277_v54  ;;  %v280_v3 = vmax.f32 %v256_v63, %v278_v55 }
 0x136   :  { %v286_v58 = vsel %vm285_vm10, %v282_v57, %v284_v56  ;;  %v287_v59 = vsel %vm285_vm10, %v284_v56, %v282_v57 }
 0x137   :  { %v301_v0 = vsub.f32 %v286_v58, %v294_v45  ;;  %v302_v1 = vsub.f32 %v287_v59, %v298_v46 }
 0x139   :  { %v308_v7 = vpop.permute.xlu1 %307  ;;  %v306_v8 = vpop.permute.xlu0 %305  ;;  %v303_v11 = vmax.f32 %v279_v2, %v301_v0  ;;  %v304_v5 = vmax.f32 %v280_v3, %v302_v1 }
 0x13a   :  { %v310_v9 = vsel %vm309_vm11, %v306_v8, %v308_v7  ;;  %v311_v10 = vsel %vm309_vm11, %v308_v7, %v306_v8 }
 0x13b   :  { %v325_v12 = vsub.f32 %v310_v9, %v318_v60  ;;  %v326_v6 = vsub.f32 %v311_v10, %v322_v61 }
 0x13d   :  { %v327_v13 = vmax.f32 %v303_v11, %v325_v12  ;;  %v328_v14 = vmax.f32 %v304_v5, %v326_v6 }
 0x13f   :  { %329 = vst [vmem:[#allocation7] sm:$0xff] %v327_v13  ;;  %330 = vst [vmem:[#allocation7 + $0x8] sm:$0xff] %v328_v14 }
 0x140   :  { %418 = shalt.err (!%p415_p6)
}
 0x141   :  { %s419_s21 = scalar_lea.hbm %s601_s2, 256 }
 0x142   :  { %p420_p7 = scmp.ne.s32.totalorder %s601_s2, %s419_s21  ;;  %p423_p8 = scmp.lt.u32.totalorder %s419_s21, %s601_s2 }
 0x144   :  { %p425_p9 = pnand %p423_p8, %p420_p7 }
 0x146   :  { %428 = shalt.err (!%p425_p9)
}
 0x147   :  { %340 = dma.vmem_to_hbm [thread:$0]  %s338_s17, 256, %s601_s2, [#allocation4]  }
 0x148   :  { %433 = dma.done.wait [#allocation4], 256  }
 0x149   :  { %434 = vsyncadd [#allocation4], 4294967040 }
 0x14a   :  { %344 = vsyncpa [#allocation3], 1 }
 0x14b   :  { %345 = vsyncpa [#allocation6], 1 }
 0x14c   :  { %346 = vsyncpa [#allocation4], 1 }

</bundles_post_ra>
